<compile_context>
chip_gen: v5e
topology: v5e:2x2
jax: 0.10.0
libtpu: 0.0.40
codegen_flags: <defaults>
</compile_context>

<pallas_src>
import functools

import jax
import jax.numpy as jnp
from jax.experimental import pallas as pl
from jax.experimental.pallas import tpu as pltpu


def _gem_mean_kernel(p_ref, x_ref, o_ref, *, eps):
    # p_ref: SMEM (1,) scalar parameter.
    # x_ref: VMEM (block_rows, S) tile of flattened feature maps.
    # o_ref: VMEM (1, 1, block_rows) lane-dense tile of per-row means of x^p.
    p = p_ref[0]
    x = x_ref[...]
    xc = jnp.maximum(x, eps)                     # clamp(min=eps); xc > 0
    xp = jnp.exp(p * jnp.log(xc))                # x^p without generic-pow filler
    m = jnp.mean(xp, axis=-1, keepdims=True)     # (block_rows, 1), f32
    o_ref[...] = jnp.reshape(m, o_ref.shape)     # lane-dense store (XLU relayout)


def _pick_block_rows(R, S, itemsize=4, tile_budget_bytes=24 * 1024 * 1024,
                     max_rows=4096):
    """Largest sublane-aligned row tile whose double-buffered input fits budget."""
    rows_by_vmem = tile_budget_bytes // (2 * S * itemsize)
    br = max(8, min(max_rows, rows_by_vmem))
    br = max(8, (br // 8) * 8)                   # multiple of 8 (f32 sublane tile)
    r_ceil = pl.cdiv(R, 8) * 8
    return min(br, r_ceil)


def gem_pallas(x, p, eps=1e-06):
    """x: (N, C, H, W) float32; p: scalar parameter. Returns (N, C, 1, 1)."""
    N, C, H, W = x.shape
    R, S = N * C, H * W
    x2 = x.reshape(R, S)                         # no padding copy; ragged grid

    block_rows = _pick_block_rows(R, S, x2.dtype.itemsize)
    num_blocks = pl.cdiv(R, block_rows)
    # TODO(synk): for very large H*W (>~64K elems/row) add a second 'arbitrary'
    # grid axis over S with a VMEM accumulator; also consider a channel-on-lanes
    # layout / bf16 ingest for tiny feature maps (7x7 / 14x14) on v6e/v7x.

    p_arr = jnp.asarray(p, jnp.float32).reshape(1)

    cost = pl.CostEstimate(
        flops=5 * R * S,
        transcendentals=2 * R * S,
        bytes_accessed=R * S * x2.dtype.itemsize + num_blocks * block_rows * 4 + 4,
    )

    means = pl.pallas_call(
        functools.partial(_gem_mean_kernel, eps=float(eps)),
        out_shape=jax.ShapeDtypeStruct((num_blocks, 1, block_rows), jnp.float32),
        grid=(num_blocks,),
        in_specs=[
            pl.BlockSpec(memory_space=pltpu.MemorySpace.SMEM),     # p (scalar)
            pl.BlockSpec((block_rows, S), lambda i: (i, 0)),       # x tile
        ],
        out_specs=pl.BlockSpec((1, 1, block_rows), lambda i: (i, 0, 0)),
        compiler_params=pltpu.CompilerParams(
            dimension_semantics=("parallel",),
            vmem_limit_bytes=48 * 1024 * 1024,
        ),
        cost_estimate=cost,
    )(p_arr, x2)

    means = means.reshape(-1)[:R]                # drop ragged-block garbage rows
    out = jnp.power(means, 1.0 / p)              # final root on tiny (R,) vector
    return out.reshape(N, C, 1, 1).astype(x.dtype)


def gem_reference(x, p, eps=1e-06):
    xc = jnp.maximum(x, eps)
    xp = jnp.power(xc, p)
    m = jnp.mean(xp, axis=(-2, -1), keepdims=True)
    return jnp.power(m, 1.0 / p)


if __name__ == "__main__":
    key = jax.random.PRNGKey(0)
    N, C, H, W = 2, 4, 16, 16
    x = jax.random.uniform(key, (N, C, H, W), dtype=jnp.float32)

    # Deterministic parameter init, matching nn.Parameter(torch.ones(1) * 3).
    p_param = jnp.ones((1,), dtype=jnp.float32) * 3.0
    eps = 1e-06

    out = gem_pallas(x, p_param[0], eps=eps)
    out = jax.block_until_ready(out)

    ref = gem_reference(x, p_param[0], eps=eps)
    assert out.shape == (N, C, 1, 1)
    assert jnp.allclose(out, ref, rtol=1e-5, atol=1e-5)

    print("KERNEL_OK")
</pallas_src>

<mosaic_0001>
module attributes {stable_mosaic.version = 11 : i64} {
  func.func @_gem_mean_kernel(%arg0: i32, %arg1: memref<1xf32, #tpu.memory_space<smem>>, %arg2: memref<8x256xf32, #tpu.memory_space<vmem>>, %arg3: memref<1x1x8xf32, #tpu.memory_space<vmem>>) attributes {dimension_semantics = [#tpu.dimension_semantics<parallel>], iteration_bounds = array<i64: 1>, scalar_prefetch = 0 : i64, scratch_operands = 0 : i64, tpu.core_type = #tpu.core_type<tc>, window_params = [{transform_indices = @transform_0, window_bounds = array<i64: 1>}, {transform_indices = @transform_1, window_bounds = array<i64: 8, 256>}, {transform_indices = @transform_2, window_bounds = array<i64: 1, 1, 8>}]} {
    %c0 = arith.constant 0 : index
    %0 = memref.load %arg1[%c0] : memref<1xf32, #tpu.memory_space<smem>>
    %c0_0 = arith.constant 0 : index
    %c0_1 = arith.constant 0 : index
    %1 = vector.load %arg2[%c0_0, %c0_1] : memref<8x256xf32, #tpu.memory_space<vmem>>, vector<8x256xf32>
    %cst = arith.constant 9.99999997E-7 : f32
    %2 = vector.broadcast %cst : f32 to vector<8x256xf32>
    %3 = arith.maximumf %1, %2 : vector<8x256xf32>
    %4 = math.log %3 : vector<8x256xf32>
    %5 = vector.broadcast %0 : f32 to vector<8x256xf32>
    %6 = arith.mulf %5, %4 : vector<8x256xf32>
    %7 = math.exp %6 : vector<8x256xf32>
    %cst_2 = arith.constant dense<0.000000e+00> : vector<8xf32>
    %8 = vector.multi_reduction <add>, %7, %cst_2 [1] : vector<8x256xf32> to vector<8xf32>
    %9 = vector.shape_cast %8 : vector<8xf32> to vector<8x1xf32>
    %cst_3 = arith.constant 2.560000e+02 : f32
    %10 = vector.broadcast %cst_3 : f32 to vector<8x1xf32>
    %11 = arith.divf %9, %10 : vector<8x1xf32>
    %12 = vector.shape_cast %11 : vector<8x1xf32> to vector<1x1x8xf32>
    %c0_4 = arith.constant 0 : index
    %c0_5 = arith.constant 0 : index
    %c0_6 = arith.constant 0 : index
    %13 = vector.load %arg3[%c0_4, %c0_5, %c0_6] : memref<1x1x8xf32, #tpu.memory_space<vmem>>, vector<1x1x8xf32>
    tpu.vector_store %arg3[%c0_4, %c0_5, %c0_6], %12 {strides = array<i32>} : memref<1x1x8xf32, #tpu.memory_space<vmem>>, vector<1x1x8xf32>,
    return
  }
  func.func @transform_0(%arg0: i32) -> i32 {
    %c0_i32 = arith.constant 0 : i32
    %c0_i32_0 = arith.constant 0 : i32
    return %c0_i32 : i32
  }
  func.func @transform_1(%arg0: i32) -> (i32, i32) {
    %c0_i32 = arith.constant 0 : i32
    %c0_i32_0 = arith.constant 0 : i32
    return %arg0, %c0_i32 : i32, i32
  }
  func.func @transform_2(%arg0: i32) -> (i32, i32, i32) {
    %c0_i32 = arith.constant 0 : i32
    %c0_i32_0 = arith.constant 0 : i32
    %c0_i32_1 = arith.constant 0 : i32
    return %arg0, %c0_i32, %c0_i32_0 : i32, i32, i32
  }
}

</mosaic_0001>

<bundles_post_ra>
// kernel: tpu_custom_call.1
= control target key start
LH: loop header
LB: loop body
LE: loop exit
PB: predicated region body
PF: predicated region fallthrough
CT: control target
= control target key end

     0   :  { %8 = vsyncpa [#allocation4], 0  ;;  %s170_s0 = inlined_call_operand.<no memory space> [shape: f32[1], index: 0, kind: input, shape index: {}]   ;;  %s171_s1 = inlined_call_operand.hbm [shape: f32[8,256], index: 1, kind: input, shape index: {}]   ;;  %s172_s2 = inlined_call_operand.hbm [shape: f32[1,1,8], index: 2, kind: output, shape index: {}]  }
   0x1   :  { %9 = vsyncpa [#allocation5], 0  ;;  %s17_s11 = sshll.u32 %s171_s1, 4  ;;  %s143_s12 = smov [#allocation3]   ;;  %s18_s11 = int_to_ptr.hbm [resolvable:$true] %s17_s11 }
   0x2   :  { %s19_s13 = sshll.u32 %s143_s12, 4  ;;  %s20_s13 = int_to_ptr.vmem [resolvable:$true] %s19_s13 }
   0x3   :  { %22 = dma.hbm_to_vmem [thread:$0]  %s18_s11, 256, %s20_s13, [#allocation4]  }
   0x4   :  { %139 = dma.done.wait [#allocation4], 256  }
   0x5   :  { %140 = vsyncadd [#allocation4], 4294967040  ;;  %v28_v0 = vld [vmem:[#allocation3] sm:$0xff]  ;;  %v29_v1 = vld [vmem:[#allocation3 + $0x8] sm:$0xff]  ;;  %v36_v5 = vstv %s170_s0  ;;  %v144_v16 = vmov 256.0   ;;  %v55_v22 = vlaneseq  ;;  %s145_s0 = smov [#allocation6]  }
   0x6   :  { %v30_v2 = vmax.f32 %v28_v0, 1e-06  ;;  %v31_v3 = vmax.f32 %v29_v1, 1e-06  ;;  %s66_s1 = sshll.u32 %s145_s0, 4  ;;  %s68_s18 = sshll.u32 %s172_s2, 4  ;;  %s67_s1 = int_to_ptr.vmem [resolvable:$true] %s66_s1  ;;  %s69_s18 = int_to_ptr.hbm [resolvable:$true] %s68_s18 }
   0x7   :  { %v56_v24 = vand.u32 127, %v55_v22  ;;  %vm59_vm1 = vcmask 57344  }
   0x8   :  { %81 = vlog2.f32 %v30_v2 }
   0x9   :  { %83 = vlog2.f32 %v31_v3 }
   0xe   :  { %v82_v4 = vpop.eup %81 }
   0xf   :  { %v84_v6 = vpop.eup %83  ;;  %v33_v7 = vmul.f32 0.6931472, %v82_v4 }
  0x10   :  { %v35_v8 = vmul.f32 0.6931472, %v84_v6 }
  0x11   :  { %v37_v9 = vmul.f32 %v36_v5, %v33_v7 }
  0x12   :  { %v38_v10 = vmul.f32 %v36_v5, %v35_v8 }
  0x13   :  { %v39_v11 = vmul.f32 1.442695, %v37_v9 }
  0x14   :  { %v41_v12 = vmul.f32 1.442695, %v38_v10 }
  0x15   :  { %85 = vpow2.f32 %v39_v11 }
  0x16   :  { %87 = vpow2.f32 %v41_v12 }
  0x17   :  { %89 = vrcp.f32 %v144_v16 }
  0x1b   :  { %v86_v13 = vpop.eup %85 }
  0x1c   :  { %v88_v14 = vpop.eup %87 }
  0x1d   :  { %v43_v15 = vadd.f32 %v88_v14, %v86_v13  ;;  %v90_v17 = vpop.eup %89 }
  0x1e   :  { %v47_v18 = vmul.f32 256.0, %v90_v17  ;;  %vm51_vm0 = vweird.f32 %v90_v17 }
  0x1f   :  { %44 = vadd.xlane.f32.xlu0 %v43_v15 }
  0x20   :  { %v48_v19 = vsub.f32 1.0, %v47_v18 }
  0x22   :  { %v49_v20 = vmul.f32 %v90_v17, %v48_v19 }
  0x24   :  { %v50_v21 = vadd.f32 %v90_v17, %v49_v20 }
  0x26   :  { %v52_v23 = vsel %vm51_vm0, %v90_v17, %v50_v21 }
  0x92   :  { %v45_v25 = vpop.xlane.xlu0 %44 }
  0x93   :  { %v53_v26 = vmul.f32 %v52_v23, %v45_v25 }
  0x95   :  { %v57_v27 = vperm.slane %v53_v26, %v56_v24 }
  0x97   :  { %60 = vst.msk [vmem:[#allocation6] sm:$0x1] %vm59_vm1, %v57_v27 }
  0x98   :  { %71 = dma.vmem_to_hbm [thread:$0]  %s67_s1, 16, %s69_s18, [#allocation5]  }
  0x99   :  { %141 = dma.done.wait [#allocation5], 16  }
  0x9a   :  { %142 = vsyncadd [#allocation5], 4294967280 }
  0x9b   :  { %76 = vsyncpa [#allocation4], 1 }
  0x9c   :  { %77 = vsyncpa [#allocation5], 1 }

</bundles_post_ra>
